<compile_context>
chip_gen: v7x
topology: tpu7x:2x2x1
jax: 0.10.0
libtpu: 0.0.40
codegen_flags: <defaults>
</compile_context>

<pallas_src>
import jax
import jax.numpy as jnp
from jax.experimental import pallas as pl
from jax.experimental.pallas import tpu as pltpu

_LANE = 128
_MIN_TILE_HW = 512  # keep contiguous HBM runs >= ~2 KiB and lane-dense stores


def _soft_ce_kernel(logits_ref, targets_ref, out_ref):
    # Refs: (NB, C, TILE_HW) VMEM tiles; softmax axis is axis=1 (channels).
    x = logits_ref[...].astype(jnp.float32)
    t = targets_ref[...].astype(jnp.float32)

    # numerically-stable log-softmax over the channel axis
    m = jnp.max(x, axis=1, keepdims=True)                            # (NB, 1, T)
    shifted = x - m                                                  # (NB, C, T)
    lse = jnp.log(jnp.sum(jnp.exp(shifted), axis=1, keepdims=True))  # (NB, 1, T)

    # -log_softmax(x) * t  ==  (lse - shifted) * t   (negation folded in)
    out_ref[...] = ((lse - shifted) * t).astype(out_ref.dtype)


def _round_up(x, m):
    return ((x + m - 1) // m) * m


def _cdiv(a, b):
    return -(-a // b)


def _largest_divisor_leq(n, k):
    k = max(1, min(n, k))
    while n % k:
        k -= 1
    return k


def _tpu_vmem_capacity():
    try:
        info = pltpu.get_tpu_info()
        cap = getattr(info, "vmem_capacity_bytes", None)
        if cap:
            return int(cap)
    except Exception:
        pass
    return 64 * 1024 * 1024  # conservative (v7x per-TensorCore physical VMEM)


def _plan(N, C, HW, itemsize):
    """Choose (NB, TILE_HW, vmem_limit_bytes) from a generation-aware byte budget.

    Pipelined footprint ~= 3 arrays x 2 buffers x (NB, C_pad, TILE_HW) blocks.
    """
    cap = _tpu_vmem_capacity()
    # ~3/8 of physical VMEM for the pipelined footprint:
    #   v7x (64 MiB)  -> 24 MiB;  v5e/v6e (128 MiB) -> 48 MiB.
    budget = min(max(cap * 3 // 8, 12 << 20), 48 << 20)

    # Sublane-padded bytes of one lane column of the channel axis
    # (f32 pads C to 8 sublanes x 4 B, bf16 to 16 x 2 B -> 32-byte granularity).
    col_bytes = _round_up(max(C, 1) * itemsize, 32)

    # Largest lane tile (multiple of 128) that keeps 6 blocks inside the budget.
    max_lanes = (budget // (6 * col_bytes)) // _LANE * _LANE
    # Very large C: prefer >= 512 lanes per block for efficient strided DMA runs
    # as long as the footprint still fits comfortably in physical VMEM.
    min_lanes = _MIN_TILE_HW if 6 * col_bytes * _MIN_TILE_HW <= cap - (16 << 20) else _LANE
    max_lanes = max(max_lanes, min_lanes)

    if HW > max_lanes:
        nb = 1
        tile_hw = max_lanes
        # v7x: keep at least ~4 grid steps so both TensorCores get work.
        if N * _cdiv(HW, tile_hw) < 4:
            want_tiles = _cdiv(4, N)
            tile_hw = min(tile_hw,
                          max(min_lanes, _round_up(_cdiv(HW, want_tiles), _LANE)))
    else:
        # Whole spatial extent in one lane tile (allowed: equals the full dim);
        # fold batch into the block to keep per-step DMAs large.
        tile_hw = HW
        lanes_eff = _round_up(HW, _LANE)
        nb_cap = max(1, budget // (6 * col_bytes * lanes_eff))
        nb_cap = min(nb_cap, max(1, N // min(4, N)))   # keep >= min(4, N) steps
        nb = _largest_divisor_leq(N, nb_cap)

    footprint = 6 * nb * col_bytes * _round_up(tile_hw, _LANE)
    vmem_limit = min(max(32 << 20, footprint + (16 << 20)),
                     max(cap - (8 << 20), 32 << 20))
    return nb, tile_hw, int(vmem_limit)


def soft_cross_entropy_loss(logits, targets, *, _plan_override=None):
    """logits, targets: (N, C, H, W).  Returns the elementwise loss, same shape."""
    assert logits.shape == targets.shape
    N, C, H, W = logits.shape
    HW = H * W
    itemsize = jnp.dtype(logits.dtype).itemsize

    if _plan_override is not None:
        NB, TILE_HW, vmem_limit = _plan_override
    else:
        NB, TILE_HW, vmem_limit = _plan(N, C, HW, itemsize)

    # Free reshapes (contiguous); no padding, no post-slice -> no extra HBM passes.
    logits_r = logits.reshape(N, C, HW)
    targets_r = targets.reshape(N, C, HW)

    grid = (pl.cdiv(N, NB), pl.cdiv(HW, TILE_HW))

    elems = N * C * HW  # true (unpadded) element count
    cost = pl.CostEstimate(
        flops=5 * elems,                 # max, sub, sum-combine, sub, mul (approx)
        transcendentals=elems,           # exp (+ one log per column, negligible)
        bytes_accessed=3 * elems * itemsize,
    )

    block = lambda: pl.BlockSpec((NB, C, TILE_HW), lambda n, s: (n, 0, s))

    out = pl.pallas_call(
        _soft_ce_kernel,
        out_shape=jax.ShapeDtypeStruct((N, C, HW), logits.dtype),
        grid_spec=pltpu.PrefetchScalarGridSpec(
            num_scalar_prefetch=0,
            grid=grid,
            in_specs=[block(), block()],
            out_specs=block(),
        ),
        compiler_params=pltpu.CompilerParams(
            dimension_semantics=("parallel", "parallel"),
            vmem_limit_bytes=vmem_limit,
        ),
        cost_estimate=cost,
    )(logits_r, targets_r)

    return out.reshape(N, C, H, W)


def _reference(logits, targets):
    # pure-JAX reference matching PyTorch: -log_softmax(logits, dim=1) * targets
    log_probs = jax.nn.log_softmax(logits.astype(jnp.float32), axis=1)
    return (-1.0 * log_probs * targets.astype(jnp.float32)).astype(logits.dtype)


if __name__ == "__main__":
    key = jax.random.PRNGKey(0)
    k1, k2, k3, k4 = jax.random.split(key, 4)

    # Primary case (module-consistent small shapes).
    N, C, H, W = 2, 4, 16, 16
    logits = jax.random.normal(k1, (N, C, H, W), dtype=jnp.float32)
    # soft targets: a probability distribution over the channel axis
    targets = jax.nn.softmax(
        jax.random.normal(k2, (N, C, H, W), dtype=jnp.float32), axis=1
    )

    loss = soft_cross_entropy_loss(logits, targets)
    loss = jax.block_until_ready(loss)

    ref = _reference(logits, targets)
    assert loss.shape == (N, C, H, W)
    assert jnp.allclose(loss, ref, atol=1e-5, rtol=1e-5), "mismatch vs reference"

    # Ragged-tail case: HW (130) not a multiple of the forced TILE_HW (128);
    # exercises the partial last lane block (masked writeback, no padding copies).
    N2, C2, H2, W2 = 2, 4, 10, 13
    lg2 = jax.random.normal(k3, (N2, C2, H2, W2), dtype=jnp.float32)
    tg2 = jax.nn.softmax(
        jax.random.normal(k4, (N2, C2, H2, W2), dtype=jnp.float32), axis=1
    )
    loss2 = soft_cross_entropy_loss(lg2, tg2, _plan_override=(1, 128, 32 << 20))
    loss2 = jax.block_until_ready(loss2)
    ref2 = _reference(lg2, tg2)
    assert jnp.allclose(loss2, ref2, atol=1e-5, rtol=1e-5), "ragged-tail mismatch"

    print("KERNEL_OK")
</pallas_src>

<mosaic_0001>
module attributes {stable_mosaic.version = 11 : i64} {
  func.func @_soft_ce_kernel(%arg0: i32, %arg1: i32, %arg2: memref<1x4x256xf32, #tpu.memory_space<vmem>>, %arg3: memref<1x4x256xf32, #tpu.memory_space<vmem>>, %arg4: memref<1x4x256xf32, #tpu.memory_space<vmem>>) attributes {dimension_semantics = [#tpu.dimension_semantics<parallel>, #tpu.dimension_semantics<parallel>], iteration_bounds = array<i64: 2, 1>, scalar_prefetch = 0 : i64, scratch_operands = 0 : i64, tpu.core_type = #tpu.core_type<tc>, window_params = [{transform_indices = @transform_0, window_bounds = array<i64: 1, 4, 256>}, {transform_indices = @transform_1, window_bounds = array<i64: 1, 4, 256>}, {transform_indices = @transform_2, window_bounds = array<i64: 1, 4, 256>}]} {
    %c0 = arith.constant 0 : index
    %c0_0 = arith.constant 0 : index
    %c0_1 = arith.constant 0 : index
    %0 = vector.load %arg2[%c0, %c0_0, %c0_1] : memref<1x4x256xf32, #tpu.memory_space<vmem>>, vector<1x4x256xf32>
    %c0_2 = arith.constant 0 : index
    %c0_3 = arith.constant 0 : index
    %c0_4 = arith.constant 0 : index
    %1 = vector.load %arg3[%c0_2, %c0_3, %c0_4] : memref<1x4x256xf32, #tpu.memory_space<vmem>>, vector<1x4x256xf32>
    %cst = arith.constant dense<0xFF800000> : vector<1x256xf32>
    %2 = vector.multi_reduction <maximumf>, %0, %cst [1] : vector<1x4x256xf32> to vector<1x256xf32>
    %3 = vector.shape_cast %2 : vector<1x256xf32> to vector<1x1x256xf32>
    %4 = vector.broadcast %3 : vector<1x1x256xf32> to vector<1x4x256xf32>
    %5 = arith.subf %0, %4 : vector<1x4x256xf32>
    %6 = math.exp %5 : vector<1x4x256xf32>
    %cst_5 = arith.constant dense<0.000000e+00> : vector<1x256xf32>
    %7 = vector.multi_reduction <add>, %6, %cst_5 [1] : vector<1x4x256xf32> to vector<1x256xf32>
    %8 = vector.shape_cast %7 : vector<1x256xf32> to vector<1x1x256xf32>
    %9 = math.log %8 : vector<1x1x256xf32>
    %10 = vector.broadcast %9 : vector<1x1x256xf32> to vector<1x4x256xf32>
    %11 = arith.subf %10, %5 : vector<1x4x256xf32>
    %12 = arith.mulf %11, %1 : vector<1x4x256xf32>
    %c0_6 = arith.constant 0 : index
    %c0_7 = arith.constant 0 : index
    %c0_8 = arith.constant 0 : index
    %13 = vector.load %arg4[%c0_6, %c0_7, %c0_8] : memref<1x4x256xf32, #tpu.memory_space<vmem>>, vector<1x4x256xf32>
    tpu.vector_store %arg4[%c0_6, %c0_7, %c0_8], %12 {strides = array<i32>} : memref<1x4x256xf32, #tpu.memory_space<vmem>>, vector<1x4x256xf32>,
    return
  }
  func.func @transform_0(%arg0: i32, %arg1: i32) -> (i32, i32, i32) {
    %c0_i32 = arith.constant 0 : i32
    %c0_i32_0 = arith.constant 0 : i32
    return %arg0, %c0_i32, %arg1 : i32, i32, i32
  }
  func.func @transform_1(%arg0: i32, %arg1: i32) -> (i32, i32, i32) {
    %c0_i32 = arith.constant 0 : i32
    %c0_i32_0 = arith.constant 0 : i32
    return %arg0, %c0_i32, %arg1 : i32, i32, i32
  }
  func.func @transform_2(%arg0: i32, %arg1: i32) -> (i32, i32, i32) {
    %c0_i32 = arith.constant 0 : i32
    %c0_i32_0 = arith.constant 0 : i32
    return %arg0, %c0_i32, %arg1 : i32, i32, i32
  }
}

</mosaic_0001>

<bundles_post_ra>
// kernel: tpu_custom_call.1
= control target key start
LH: loop header
LB: loop body
LE: loop exit
PB: predicated region body
PF: predicated region fallthrough
CT: control target
= control target key end

     0   :  { %7 = vsyncpa [#allocation3], 0  ;;  %s907_s0 = inlined_call_operand.hbm [shape: f32[2,4,256], index: 0, kind: input, shape index: {}]   ;;  %s908_s1 = inlined_call_operand.hbm [shape: f32[2,4,256], index: 1, kind: input, shape index: {}]   ;;  %s909_s2 = inlined_call_operand.hbm [shape: f32[2,4,256], index: 2, kind: output, shape index: {}]  }
   0x1   :  { %9 = vsyncpa [#allocation3 + $0x1], 0 }
   0x2   :  { %10 = vsyncpa [#allocation6], 0 }
   0x3   :  { %12 = vsyncpa [#allocation6 + $0x1], 0 }
   0x4   :  { %13 = vsyncpa [#allocation4], 0 }
   0x5   :  { %15 = vsyncpa [#allocation4 + $0x1], 0  ;;  %s676_s9 = smov 0   ;;  %s678_s10 = smov 0  }
   0x6   :  { %s680_s11 = smov 0   ;;  %s682_s12 = smov 0  }
   0x7   :  { %s684_s13 = smov 0   ;;  %s686_s14 = smov 0  }
   0x8 LB: > { %s413_s15 = sadd.s32 4294967295, %s656_s14   ;;  %s414_s16 = sadd.s32 4294967294, %s656_s14   ;;  %s656_s14 = sphi %s686_s14, %s21_s14   ;;  %s652_s13 = sphi %s684_s13, %s929_s13   ;;  %s648_s12 = sphi %s682_s12, %s928_s12   ;;  %s644_s11 = sphi %s680_s11, %s927_s11   ;;  %s640_s10 = sphi %s678_s10, %s926_s10   ;;  %s636_s9 = sphi %s676_s9, %s925_s9  }
   0x9   : > { %s33_s17 = sadd.s32 1, %s652_s13  ;;  %s42_s18 = sadd.s32 1, %s644_s11 }
   0xa   : > { %p35_p0 = scmp.ge.s32.totalorder %s33_s17, 2  ;;  %p49_p1 = scmp.ne.s32.totalorder %s644_s11, %s640_s10 }
   0xb   : > { %p50_p2 = scmp.eq.s32.totalorder %s656_s14, 0  ;;  %p55_p3 = scmp.ne.s32.totalorder %s640_s10, %s636_s9 }
   0xc   : > { %s931_s17 = smov (%p35_p0, %s33_s17), 0  ;;  %p56_p5 = scmp.eq.s32.totalorder %s413_s15, 0 }
   0xd   : > { %p717_p4 = por %p50_p2, %p49_p1  ;;  %s37_s20 = ssub.s32 %s652_s13, %s931_s17 }
   0xe   : > { %p109_p6 = scmp.eq.s32.totalorder %s413_s15, 1  ;;  %p40_p7 = scmp.eq.s32.totalorder %s37_s20, 0 }
   0xf   : > { %p723_p8 = por %p56_p5, %p55_p3  ;;  %p115_p10 = scmp.eq.s32.totalorder %s414_s16, 1 }
  0x10   : > { %p727_p9 = por %p109_p6, %p49_p1  ;;  %p452_p13 = scmp.lt.s32.totalorder %s656_s14, 2 }
  0x11   : > { %s913_s21 = scalar_select %p723_p8, 1, 0 }
  0x12   : > { %s914_s22 = scalar_select %p727_p9, 1, 0 }
  0x13   : > { %s732_s23 = scalar_select %p40_p7, %s644_s11, %s42_s18  }
  0x14   : > { %p734_p11 = por %p115_p10, %p55_p3  ;;  %s741_s25 = sand.u32 1, %s644_s11  }
  0x15   : > { %s417_s26 = sshll.u32 %s741_s25, 3  ;;  %s432_s27 = sshll.u32 %s652_s13, 7 }
  0x16   : > { %s915_s24 = scalar_select %p734_p11, 1, 0 }
  0x17   : > { %s750_s30 = scalar_lea.hbm %s907_s0, %s432_s27  ;;  %s139_s3 = scalar_lea.vmem [#allocation2], %s417_s26 }
  0x18   : > { %s149_s4 = sshll.u32 %s139_s3, 4  ;;  %p758_p0 = pnand %p452_p13, %p717_p4  ;;  %s754_s4 = int_to_ptr.vmem [resolvable:$true] %s149_s4 }
  0x19   : > { %s136_s6 = scalar_lea.sflag [#allocation3], %s741_s25  ;;  %s510_s7 = scalar_lea.hbm %s750_s30, 128 }
  0x1a   : > { %p511_p3 = scmp.ne.s32.totalorder %s750_s30, %s510_s7  ;;  %p512_p5 = pneg %p758_p0 }
  0x1b   : > { %s515_s16 = scalar_lea.hbm %s907_s0, 256  ;;  %p516_p4 = scmp.lt.u32.totalorder %s750_s30, %s907_s0 }
  0x1c   : > { %p513_p6 = pnand %p512_p5, %p511_p3  ;;  %p517_p10 = scmp.lt.u32.totalorder %s515_s16, %s510_s7 }
  0x1d   : > { %p519_p12 = scmp.lt.u32.totalorder %s510_s7, %s750_s30 }
  0x1e   : > { %p514_p7 = pneg %p513_p6  ;;  %p518_p13 = por %p517_p10, %p516_p4 }
  0x20   : > { %p520_p1 = por %p519_p12, %p518_p13 }
  0x22   : > { %p521_p2 = pnand %p520_p1, %p514_p7 }
  0x24   : > { %524 = shalt.err (!%p521_p2)
}
  0x25   : > { %s525_s20 = scalar_lea.vmem %s754_s4, 128  ;;  %s658_s28 = smov [#allocation2]  }
  0x26   : > { %p526_p3 = scmp.ne.s32.totalorder %s754_s4, %s525_s20  ;;  %s530_s29 = sshll.u32 %s658_s28, 4  ;;  %s531_s29 = int_to_ptr.vmem [resolvable:$false] %s530_s29 }
  0x27   : > { %s532_s3 = scalar_lea.vmem %s531_s29, 256  ;;  %p533_p9 = scmp.lt.s32.totalorder %s754_s4, %s531_s29 }
  0x28   : > { %p528_p6 = pnand %p526_p3, %p512_p5  ;;  %p534_p4 = scmp.lt.s32.totalorder %s532_s3, %s525_s20 }
  0x2a   : > { %p529_p11 = pneg %p528_p6  ;;  %p535_p10 = por %p534_p4, %p533_p9 }
  0x2c   : > { %p536_p12 = pnand %p535_p10, %p529_p11 }
  0x2e   : > { %539 = shalt.err (!%p536_p12)
}
  0x2f   : > { %444 = dma.hbm_to_vmem [thread:$0]  (!%p758_p0), %s750_s30, 128, %s754_s4, %s136_s6  }
  0x30   : > { %p917_p1 = scmp.lt.s32.totalorder %s656_s14, 3  ;;  %p918_p2 = scmp.ge.s32.totalorder %s656_s14, 1 }
  0x31   : > { %s803_s16 = scalar_lea.hbm %s908_s1, %s432_s27  ;;  %s160_s18 = scalar_lea.vmem [#allocation5], %s417_s26 }
  0x32   : > { %p794_p7 = pnand %p918_p2, %p917_p1  ;;  %s170_s19 = sshll.u32 %s160_s18, 4  ;;  %s171_s19 = int_to_ptr.vmem [resolvable:$true] %s170_s19 }
  0x33   : > { %s157_s30 = scalar_lea.sflag [#allocation6], %s741_s25  ;;  %s540_s4 = scalar_lea.hbm %s803_s16, 128 }
  0x34   : > { %s919_s7 = scalar_select %p794_p7, 1, 0 }
  0x35   : > { %p541_p9 = scmp.ne.s32.totalorder %s803_s16, %s540_s4  ;;  %s545_s27 = scalar_lea.hbm %s908_s1, 256 }
  0x36   : > { %p546_p3 = scmp.lt.u32.totalorder %s803_s16, %s908_s1  ;;  %p547_p6 = scmp.lt.u32.totalorder %s545_s27, %s540_s4 }
  0x37   : > { %p543_p11 = pnand %p541_p9, %p512_p5  ;;  %p549_p10 = scmp.lt.u32.totalorder %s540_s4, %s803_s16 }
  0x38   : > { %p548_p4 = por %p547_p6, %p546_p3 }
  0x39   : > { %p544_p13 = pneg %p543_p11 }
  0x3a   : > { %p550_p12 = por %p549_p10, %p548_p4 }
  0x3c   : > { %p551_p1 = pnand %p550_p12, %p544_p13 }
  0x3e   : > { %554 = shalt.err (!%p551_p1)
}
  0x3f   : > { %s555_s25 = scalar_lea.vmem %s171_s19, 128  ;;  %s659_s26 = smov [#allocation5]  }
  0x40   : > { %p556_p2 = scmp.ne.s32.totalorder %s171_s19, %s555_s25  ;;  %s560_s3 = sshll.u32 %s659_s26, 4  ;;  %s561_s3 = int_to_ptr.vmem [resolvable:$false] %s560_s3 }
  0x41   : > { %s562_s8 = scalar_lea.vmem %s561_s3, 256  ;;  %p563_p8 = scmp.lt.s32.totalorder %s171_s19, %s561_s3 }
  0x42   : > { %p558_p9 = pnand %p556_p2, %p512_p5  ;;  %p564_p7 = scmp.lt.s32.totalorder %s562_s8, %s555_s25 }
  0x44   : > { %p559_p11 = pneg %p558_p9  ;;  %p565_p3 = por %p564_p7, %p563_p8 }
  0x46   : > { %p566_p6 = pnand %p565_p3, %p559_p11 }
  0x48   : > { %569 = shalt.err (!%p566_p6)
}
  0x49   : > { %447 = dma.hbm_to_vmem [thread:$0]  (!%p758_p0), %s803_s16, 128, %s171_s19, %s157_s30  }
  0x4a   : > { %p920_p13 = scmp.ne.s32.totalorder %s919_s7, 0 }
  0x4b   : > { %s830_s15 = sand.u32 (!%p920_p13), 1, %s640_s10   ;;  %p921_p8 = scmp.ne.s32.totalorder (!%p920_p13), %s913_s21, 0 }
  0x4c   : > { %179 = sbr.rel (%p920_p13) target bundleno = 167 (0xa7), region = 28  ;;  %s833_s18 = sshll.u32 (!%p920_p13), %s830_s15, 3 }
  0x4d   : > { %s182_s4 = scalar_lea.sflag (!%p920_p13), [#allocation3], %s830_s15  ;;  %s185_s6 = scalar_lea.vmem (!%p920_p13), [#allocation2], %s833_s18 }
  0x53   : > { %623 = dma.done.wait (%p921_p8), %s182_s4, 128  }
  0x54   : > { %625 = vsyncadd (%p921_p8), %s182_s4, 4294967168  ;;  %s191_s5 = scalar_lea.sflag [#allocation6], %s830_s15  ;;  %s194_s7 = scalar_lea.vmem [#allocation5], %s833_s18 }
  0x55   : > { %627 = dma.done.wait (%p921_p8), %s191_s5, 128  }
  0x56   : > { %629 = vsyncadd (%p921_p8), %s191_s5, 4294967168  ;;  %vm228_vm0 = vcmask 1043456   ;;  %v223_v0 = vld [vmem:[%s185_s6] sm:$0xff]  ;;  %v224_v36 = vld [vmem:[%s194_s7] sm:$0xff]  ;;  %s219_s21 = scalar_lea.vmem [#allocation7], %s833_s18  ;;  %s434_s19 = sshll.u32 %s648_s12, 7 }
  0x57   : > { %v226_v1 = vcombine.high %v223_v0, %v223_v0  ;;  %v229_v2 = vsel %vm228_vm0, %v223_v0, -inf  ;;  %v277_v42 = vcombine.high %v224_v36, %v224_v36  ;;  %s303_s16 = sshll.u32 %s219_s21, 4  ;;  %s860_s27 = scalar_lea.hbm %s909_s2, %s434_s19  ;;  %s855_s16 = int_to_ptr.vmem [resolvable:$true] %s303_s16 }
  0x58   : > { %v230_v3 = vrot.slane %v229_v2, 4  ;;  %s287_s28 = scalar_lea.sflag [#allocation4], %s830_s15  ;;  %s570_s29 = scalar_lea.vmem %s855_s16, 128 }
  0x59   : > { %v236_v4 = vsel %vm228_vm0, %v226_v1, -inf  ;;  %p571_p0 = scmp.ne.s32.totalorder %s855_s16, %s570_s29  ;;  %p922_p5 = scmp.ne.s32.totalorder %s914_s22, 0 }
  0x5a   : > { %v231_v5 = vmax.f32 %v229_v2, %v230_v3  ;;  %v237_v6 = vrot.slane %v236_v4, 4  ;;  %s660_s12 = smov [#allocation7]  }
  0x5b   : > { %p572_p7 = pnand %p571_p0, %p922_p5  ;;  %s574_s25 = sshll.u32 %s660_s12, 4  ;;  %s575_s25 = int_to_ptr.vmem [resolvable:$false] %s574_s25 }
  0x5c   : > { %v232_v7 = vrot.slane %v231_v5, 2  ;;  %v238_v8 = vmax.f32 %v236_v4, %v237_v6  ;;  %s576_s26 = scalar_lea.vmem %s575_s25, 256  ;;  %p577_p10 = scmp.lt.s32.totalorder %s855_s16, %s575_s25 }
  0x5d   : > { %p573_p4 = pneg %p572_p7  ;;  %p578_p12 = scmp.lt.s32.totalorder %s576_s26, %s570_s29 }
  0x5e   : > { %v233_v9 = vmax.f32 %v231_v5, %v232_v7  ;;  %v239_v10 = vrot.slane %v238_v8, 2 }
  0x5f   : > { %p579_p1 = por %p578_p12, %p577_p10 }
  0x60   : > { %v234_v11 = vrot.slane %v233_v9, 1  ;;  %v240_v12 = vmax.f32 %v238_v8, %v239_v10 }
  0x61   : > { %p580_p2 = pnand %p579_p1, %p573_p4 }
  0x62   : > { %v235_v13 = vmax.f32 %v233_v9, %v234_v11  ;;  %v241_v14 = vrot.slane %v240_v12, 1 }
  0x64   : > { %v242_v15 = vmax.f32 %v240_v12, %v241_v14 }
  0x66   : > { %v245_v16 = vcombine.low %v235_v13, %v242_v15 }
  0x68   : > { %v247_v17 = vsub.f32 %v223_v0, %v245_v16 }
  0x6a   : > { %v248_v18 = vmul.f32 1.442695, %v247_v17  ;;  %v272_v38 = vcombine.high %v247_v17, %v247_v17 }
  0x6c   : > { %504 = vpow2.f32 %v248_v18 }
  0x76   : > { %v505_v19 = vpop.eup %504 }
  0x77   : > { %v251_v20 = vcombine.high %v505_v19, %v505_v19  ;;  %v253_v21 = vsel %vm228_vm0, %v505_v19, 0.0 }
  0x78   : > { %v254_v22 = vrot.slane %v253_v21, 4 }
  0x79   : > { %v260_v23 = vsel %vm228_vm0, %v251_v20, 0.0 }
  0x7a   : > { %v255_v24 = vadd.f32 %v254_v22, %v253_v21  ;;  %v261_v25 = vrot.slane %v260_v23, 4 }
  0x7c   : > { %v256_v26 = vrot.slane %v255_v24, 2  ;;  %v262_v27 = vadd.f32 %v261_v25, %v260_v23 }
  0x7e   : > { %v257_v28 = vadd.f32 %v256_v26, %v255_v24  ;;  %v263_v29 = vrot.slane %v262_v27, 2 }
  0x80   : > { %v258_v30 = vrot.slane %v257_v28, 1  ;;  %v264_v31 = vadd.f32 %v263_v29, %v262_v27 }
  0x82   : > { %v259_v32 = vadd.f32 %v258_v30, %v257_v28  ;;  %v265_v33 = vrot.slane %v264_v31, 1 }
  0x84   : > { %v266_v34 = vadd.f32 %v265_v33, %v264_v31  ;;  %506 = vlog2.f32 %v259_v32 }
  0x86   : > { %508 = vlog2.f32 %v266_v34 }
  0x8e   : > { %v507_v35 = vpop.eup %506 }
  0x8f   : > { %v268_v37 = vmul.f32 0.6931472, %v507_v35 }
  0x90   : > { %v509_v39 = vpop.eup %508 }
  0x91   : > { %v270_v40 = vmul.f32 0.6931472, %v509_v39  ;;  %v274_v41 = vsub.f32 %v268_v37, %v247_v17 }
  0x93   : > { %v275_v43 = vsub.f32 %v270_v40, %v272_v38  ;;  %v279_v44 = vmul.f32 %v274_v41, %v224_v36 }
  0x95   : > { %v280_v45 = vmul.f32 %v277_v42, %v275_v43 }
  0x97   : > { %v283_v46 = vcombine.low %v279_v44, %v280_v45 }
  0x99   : > { %285 = vst [vmem:[%s219_s21] sm:$0xff] %v283_v46 }
  0x9a   : > { %583 = shalt.err (!%p580_p2)
}
  0x9b   : > { %s584_s3 = scalar_lea.hbm %s860_s27, 128  ;;  %s588_s18 = scalar_lea.hbm %s909_s2, 256 }
  0x9c   : > { %p585_p9 = scmp.ne.s32.totalorder %s860_s27, %s584_s3  ;;  %p589_p6 = scmp.lt.u32.totalorder %s860_s27, %s909_s2 }
  0x9d   : > { %p590_p13 = scmp.lt.u32.totalorder %s588_s18, %s584_s3  ;;  %p592_p0 = scmp.lt.u32.totalorder %s584_s3, %s860_s27 }
  0x9e   : > { %p586_p11 = pnand %p585_p9, %p922_p5 }
  0x9f   : > { %p591_p8 = por %p590_p13, %p589_p6 }
  0xa0   : > { %p587_p3 = pneg %p586_p11 }
  0xa1   : > { %p593_p7 = por %p592_p0, %p591_p8 }
  0xa3   : > { %p594_p4 = pnand %p593_p7, %p587_p3 }
  0xa5   : > { %597 = shalt.err (!%p594_p4)
}
  0xa6   : > { %439 = dma.vmem_to_hbm [thread:$0]  (%p922_p5), %s855_s16, 128, %s860_s27, %s287_s28  }
  0xa7 PF: > { %s315_s5 = sand.u32 1, %s636_s9   ;;  %p923_p10 = scmp.ne.s32.totalorder %s915_s24, 0 }
  0xa8   : > { %p924_p12 = scmp.ge.s32.totalorder %s656_s14, 2  ;;  %s316_s7 = scalar_lea.sflag [#allocation4], %s315_s5 }
  0xaa   : > { %p449_p1 = pnand %p924_p12, %p923_p10 }
  0xac   : > { %631 = dma.done.wait (!%p449_p1), %s316_s7, 128  }
  0xad   : > { %633 = vsyncadd (!%p449_p1), %s316_s7, 4294967168  ;;  %s21_s14 = sadd.s32 1, %s656_s14   ;;  %s925_s9 = smov %s640_s10 }
  0xae   : > { %p18_p2 = scmp.ge.s32.totalorder %s21_s14, 4   ;;  %s926_s10 = smov %s644_s11 }
  0xaf   : > { %s927_s11 = smov %s732_s23  ;;  %s928_s12 = smov %s652_s13 }
  0xb0   : > { %s929_s13 = smov %s931_s17  ;;  %20 = sbr.rel (!%p18_p2) target bundleno = 8 (0x8), region = 86 }
  0xb7   :  { %321 = vsyncpa [#allocation3], 1 }
  0xb8   :  { %323 = vsyncpa [#allocation3 + $0x1], 1 }
  0xb9   :  { %324 = vsyncpa [#allocation6], 1 }
  0xba   :  { %326 = vsyncpa [#allocation6 + $0x1], 1 }
  0xbb   :  { %327 = vsyncpa [#allocation4], 1 }
  0xbc   :  { %329 = vsyncpa [#allocation4 + $0x1], 1 }

</bundles_post_ra>
